<compile_context>
chip_gen: v7x
topology: tpu7x:2x2x1
jax: 0.10.0
libtpu: 0.0.40
codegen_flags: <defaults>
</compile_context>

<pallas_src>
import functools
import math

import jax
import jax.numpy as jnp
from jax.experimental import pallas as pl
from jax.experimental.pallas import tpu as pltpu


# Rows per token tile.  Real deployments: ~512 on v5e/v6e (128 MiB VMEM), ~256 on v7x
# (64 MiB VMEM/TC).  128 here so the toy test still exercises multi-block grids.
_ROW_TILE_CAP = 128
_VMEM_LIMIT = 32 * 1024 * 1024   # safe default on v5e/v6e/v7x


def _row_tile(T, cap=_ROW_TILE_CAP):
    """Pick a token-tile size: full T if small, else a multiple of 8 that divides T."""
    if T <= cap:
        return T
    for tm in range(cap - cap % 8, 7, -8):
        if T % tm == 0:
            return tm
    return max(8, cap - cap % 8)   # partial last block; Pallas masks the boundary


def _compiler_params(n_axes):
    return pltpu.CompilerParams(
        dimension_semantics=("parallel",) * n_axes,
        vmem_limit_bytes=_VMEM_LIMIT,
    )


# ----------------------------- Pallas kernels -------------------------------

def _linear_kernel(x_ref, w_ref, b_ref, o_ref, *, relu):
    # x: (TM, Din) f32, w: (Din, Dout) bf16, b: (1, Dout) f32
    y = jnp.dot(x_ref[...].astype(jnp.bfloat16), w_ref[...],
                preferred_element_type=jnp.float32) + b_ref[...]
    if relu:
        y = jnp.maximum(y, 0.0)
    o_ref[...] = y


def _deform_proj_kernel(src_ref, pos_ref, wv_ref, bv_ref, woa_ref, boa_ref,
                        val_ref, oa_ref):
    # One pass over (src, pos): value = src @ Wv + bv ; off|aw = (src + pos) @ Woa + boa
    src = src_ref[...]
    q = src + pos_ref[...]
    val_ref[...] = jnp.dot(src.astype(jnp.bfloat16), wv_ref[...],
                           preferred_element_type=jnp.float32) + bv_ref[...]
    oa_ref[...] = jnp.dot(q.astype(jnp.bfloat16), woa_ref[...],
                          preferred_element_type=jnp.float32) + boa_ref[...]


def _linear_add_ln_kernel(x_ref, r_ref, w_ref, b_ref, g_ref, be_ref, o_ref):
    # LayerNorm(resid + x @ W + b), eps=1e-5
    y = jnp.dot(x_ref[...].astype(jnp.bfloat16), w_ref[...],
                preferred_element_type=jnp.float32) + b_ref[...]
    h = r_ref[...] + y
    mu = jnp.mean(h, axis=-1, keepdims=True)
    d = h - mu
    var = jnp.mean(d * d, axis=-1, keepdims=True)
    o_ref[...] = d * jax.lax.rsqrt(var + 1e-5) * g_ref[...] + be_ref[...]


def _ffn_ln_kernel(x_ref, w1_ref, b1_ref, w2_ref, b2_ref, g_ref, be_ref, o_ref):
    # LayerNorm(x + relu(x @ W1 + b1) @ W2 + b2); hidden activation stays in VMEM
    x = x_ref[...]
    h = jnp.dot(x.astype(jnp.bfloat16), w1_ref[...],
                preferred_element_type=jnp.float32) + b1_ref[...]
    h = jnp.maximum(h, 0.0)
    y = jnp.dot(h.astype(jnp.bfloat16), w2_ref[...],
                preferred_element_type=jnp.float32) + b2_ref[...]
    hh = x + y
    mu = jnp.mean(hh, axis=-1, keepdims=True)
    d = hh - mu
    var = jnp.mean(d * d, axis=-1, keepdims=True)
    o_ref[...] = d * jax.lax.rsqrt(var + 1e-5) * g_ref[...] + be_ref[...]


def _xattn_fused_kernel(src_ref, pos_ref, kv_ref, wq_ref, bq_ref, wo_ref, bo_ref,
                        g_ref, be_ref, o_ref, *, n_heads, scale):
    # Fused cross-attention block for one (batch, q-tile):
    #   q = (src + pos) @ Wq + bq ; per-head softmax(q k^T / sqrt(dh)) v ;
    #   y = concat(heads) @ Wo + bo ; out = LayerNorm(src + y)
    # src/pos: (TQ, D) f32, kv: (Lk, 2D) f32 (fused k|v projection of text), out: (TQ, D)
    src = src_ref[...]
    q = jnp.dot((src + pos_ref[...]).astype(jnp.bfloat16), wq_ref[...],
                preferred_element_type=jnp.float32) + bq_ref[...]
    kv = kv_ref[...]
    D = src.shape[-1]
    k = kv[:, :D]
    v = kv[:, D:]
    dh = D // n_heads

    heads = []
    for h in range(n_heads):              # static unroll; lane slices, no reshapes
        sl = slice(h * dh, (h + 1) * dh)
        qh = (q[:, sl] * scale).astype(jnp.bfloat16)
        kh = k[:, sl].astype(jnp.bfloat16)
        vh = v[:, sl].astype(jnp.bfloat16)
        s = jax.lax.dot_general(qh, kh, (((1,), (1,)), ((), ())),
                                preferred_element_type=jnp.float32)      # (TQ, Lk)
        s = s - jnp.max(s, axis=-1, keepdims=True)
        p = jnp.exp(s)
        p = p * pl.reciprocal(jnp.sum(p, axis=-1, keepdims=True), approx=True)
        heads.append(jnp.dot(p.astype(jnp.bfloat16), vh,
                             preferred_element_type=jnp.float32))        # (TQ, dh)

    attn = jnp.concatenate(heads, axis=-1)                               # (TQ, D)
    y = jnp.dot(attn.astype(jnp.bfloat16), wo_ref[...],
                preferred_element_type=jnp.float32) + bo_ref[...]
    hh = src + y
    mu = jnp.mean(hh, axis=-1, keepdims=True)
    d = hh - mu
    var = jnp.mean(d * d, axis=-1, keepdims=True)
    o_ref[...] = d * jax.lax.rsqrt(var + 1e-5) * g_ref[...] + be_ref[...]


# ------------------------------ kernel wrappers ------------------------------

def linear_pallas(x, w, b, relu=False):
    """y = x @ w + b (+ optional relu).  x: (T, Din) f32, w: (Din, Dout) bf16, b: (1, Dout) f32."""
    T, Din = x.shape
    Dout = w.shape[1]
    tm = _row_tile(T)
    return pl.pallas_call(
        functools.partial(_linear_kernel, relu=relu),
        out_shape=jax.ShapeDtypeStruct((T, Dout), jnp.float32),
        grid=(pl.cdiv(T, tm),),
        in_specs=[
            pl.BlockSpec((tm, Din), lambda i: (i, 0)),
            pl.BlockSpec((Din, Dout), lambda i: (0, 0)),
            pl.BlockSpec((1, Dout), lambda i: (0, 0)),
        ],
        out_specs=pl.BlockSpec((tm, Dout), lambda i: (i, 0)),
        compiler_params=_compiler_params(1),
    )(x, w, b)


def deform_proj_pallas(src2, pos2, wv, bv, woa, boa):
    """One kernel, two outputs: value = src @ Wv + bv ; off|aw = (src + pos) @ Woa + boa."""
    T, D = src2.shape
    Noa = woa.shape[1]
    tm = _row_tile(T)
    return pl.pallas_call(
        _deform_proj_kernel,
        out_shape=(jax.ShapeDtypeStruct((T, D), jnp.float32),
                   jax.ShapeDtypeStruct((T, Noa), jnp.float32)),
        grid=(pl.cdiv(T, tm),),
        in_specs=[
            pl.BlockSpec((tm, D), lambda i: (i, 0)),
            pl.BlockSpec((tm, D), lambda i: (i, 0)),
            pl.BlockSpec((D, D), lambda i: (0, 0)),
            pl.BlockSpec((1, D), lambda i: (0, 0)),
            pl.BlockSpec((D, Noa), lambda i: (0, 0)),
            pl.BlockSpec((1, Noa), lambda i: (0, 0)),
        ],
        out_specs=(pl.BlockSpec((tm, D), lambda i: (i, 0)),
                   pl.BlockSpec((tm, Noa), lambda i: (i, 0))),
        compiler_params=_compiler_params(1),
    )(src2, pos2, wv, bv, woa, boa)


def linear_add_ln_pallas(x, resid, w, b, gamma, beta):
    """LayerNorm(resid + x @ w + b).  x/resid: (T, D) f32."""
    T, Din = x.shape
    D = w.shape[1]
    tm = _row_tile(T)
    return pl.pallas_call(
        _linear_add_ln_kernel,
        out_shape=jax.ShapeDtypeStruct((T, D), jnp.float32),
        grid=(pl.cdiv(T, tm),),
        in_specs=[
            pl.BlockSpec((tm, Din), lambda i: (i, 0)),
            pl.BlockSpec((tm, D), lambda i: (i, 0)),
            pl.BlockSpec((Din, D), lambda i: (0, 0)),
            pl.BlockSpec((1, D), lambda i: (0, 0)),
            pl.BlockSpec((1, D), lambda i: (0, 0)),
            pl.BlockSpec((1, D), lambda i: (0, 0)),
        ],
        out_specs=pl.BlockSpec((tm, D), lambda i: (i, 0)),
        compiler_params=_compiler_params(1),
    )(x, resid, w, b, gamma, beta)


def ffn_ln_pallas(x, w1, b1, w2, b2, gamma, beta):
    """LayerNorm(x + relu(x @ w1 + b1) @ w2 + b2)."""
    T, D = x.shape
    F = w1.shape[1]
    tm = _row_tile(T)
    return pl.pallas_call(
        _ffn_ln_kernel,
        out_shape=jax.ShapeDtypeStruct((T, D), jnp.float32),
        grid=(pl.cdiv(T, tm),),
        in_specs=[
            pl.BlockSpec((tm, D), lambda i: (i, 0)),
            pl.BlockSpec((D, F), lambda i: (0, 0)),
            pl.BlockSpec((1, F), lambda i: (0, 0)),
            pl.BlockSpec((F, D), lambda i: (0, 0)),
            pl.BlockSpec((1, D), lambda i: (0, 0)),
            pl.BlockSpec((1, D), lambda i: (0, 0)),
            pl.BlockSpec((1, D), lambda i: (0, 0)),
        ],
        out_specs=pl.BlockSpec((tm, D), lambda i: (i, 0)),
        compiler_params=_compiler_params(1),
    )(x, w1, b1, w2, b2, gamma, beta)


def xattn_fused_pallas(src, pos, kv, wq, bq, wo, bo, gamma, beta, n_heads):
    """Fused q-proj + all-heads attention + out-proj + residual + LayerNorm.
    src/pos: (N, Lq, D) f32, kv: (N, Lk, 2D) f32 (fused k|v projection of text)."""
    N, Lq, D = src.shape
    Lk = kv.shape[1]
    tq = _row_tile(Lq)
    kern = functools.partial(_xattn_fused_kernel, n_heads=n_heads,
                             scale=1.0 / math.sqrt(D // n_heads))
    return pl.pallas_call(
        kern,
        out_shape=jax.ShapeDtypeStruct((N, Lq, D), jnp.float32),
        grid=(N, pl.cdiv(Lq, tq)),
        in_specs=[
            pl.BlockSpec((None, tq, D), lambda n, i: (n, i, 0)),
            pl.BlockSpec((None, tq, D), lambda n, i: (n, i, 0)),
            pl.BlockSpec((None, Lk, 2 * D), lambda n, i: (n, 0, 0)),
            pl.BlockSpec((D, D), lambda n, i: (0, 0)),
            pl.BlockSpec((1, D), lambda n, i: (0, 0)),
            pl.BlockSpec((D, D), lambda n, i: (0, 0)),
            pl.BlockSpec((1, D), lambda n, i: (0, 0)),
            pl.BlockSpec((1, D), lambda n, i: (0, 0)),
            pl.BlockSpec((1, D), lambda n, i: (0, 0)),
        ],
        out_specs=pl.BlockSpec((None, tq, D), lambda n, i: (n, i, 0)),
        compiler_params=_compiler_params(2),
    )(src, pos, kv, wq, bq, wo, bo, gamma, beta)


# ----------------------- MSDeformAttn (glue + kernels) ----------------------

def deform_core(value, spatial_shapes_py, sampling_locations, attention_weights):
    """Pure-JAX bilinear multi-scale sampling (== ms_deform_attn_core_pytorch).
    value: (N, S, M, Dh); sampling_locations: (N, Lq, M, L, P, 2) in [0,1];
    attention_weights: (N, Lq, M, L, P).  Returns (N, Lq, M*Dh)."""
    # TODO(synk): data-dependent bilinear gather; would need a scalar-prefetch DMA-gather
    # or one-hot-matmul Pallas kernel for large feature maps — kept in JAX here.
    N, S, M, Dh = value.shape
    _, Lq, _, L, P, _ = sampling_locations.shape
    out = jnp.zeros((N, M, Lq, Dh), jnp.float32)
    start = 0
    for lid, (H, W) in enumerate(spatial_shapes_py):
        v = value[:, start:start + H * W]                 # (N, HW, M, Dh)
        start += H * W
        v_t = jnp.transpose(v, (0, 2, 1, 3))              # (N, M, HW, Dh)
        loc = sampling_locations[:, :, :, lid]            # (N, Lq, M, P, 2)
        # grid_sample(align_corners=False): pixel = loc * size - 0.5
        x = loc[..., 0] * W - 0.5
        y = loc[..., 1] * H - 0.5
        x0 = jnp.floor(x)
        y0 = jnp.floor(y)
        lw = attention_weights[:, :, :, lid]              # (N, Lq, M, P)
        acc = jnp.zeros((N, M, Lq, P, Dh), jnp.float32)
        for dx in (0, 1):
            for dy in (0, 1):
                xi = x0 + dx
                yi = y0 + dy
                wgt = (1.0 - jnp.abs(x - xi)) * (1.0 - jnp.abs(y - yi))
                valid = ((xi >= 0) & (xi < W) & (yi >= 0) & (yi < H)).astype(jnp.float32)
                xi_c = jnp.clip(xi, 0, W - 1).astype(jnp.int32)
                yi_c = jnp.clip(yi, 0, H - 1).astype(jnp.int32)
                idx = yi_c * W + xi_c                      # (N, Lq, M, P)
                idx_t = jnp.transpose(idx, (0, 2, 1, 3)).reshape(N, M, Lq * P)
                idx_b = jnp.broadcast_to(idx_t[..., None], (N, M, Lq * P, Dh))
                g = jnp.take_along_axis(v_t, idx_b, axis=2).reshape(N, M, Lq, P, Dh)
                w_t = jnp.transpose(wgt * valid, (0, 2, 1, 3))   # (N, M, Lq, P)
                acc = acc + g * w_t[..., None]
        lw_t = jnp.transpose(lw, (0, 2, 1, 3))            # (N, M, Lq, P)
        out = out + jnp.sum(acc * lw_t[..., None], axis=3)
    return jnp.transpose(out, (0, 2, 1, 3)).reshape(N, Lq, M * Dh)


def ms_deform_attn_norm(src, pos, reference_points, spatial_shapes_py, p,
                        ln_g, ln_b, n_heads, n_levels, n_points):
    """MSDeformAttn(src+pos, ref, src) -> out_proj -> + src -> LayerNorm (norm1)."""
    N, Lq, D = src.shape
    M, L, P = n_heads, n_levels, n_points
    Dh = D // M

    # fused value / (sampling-offset | attention-weight) projections — one pass over src, pos
    value2, oa = deform_proj_pallas(src.reshape(N * Lq, D), pos.reshape(N * Lq, D),
                                    p["value_w"], p["value_b"],
                                    p["offaw_w"], p["offaw_b"])
    value = value2.reshape(N, Lq, M, Dh)
    n_off = M * L * P * 2
    off = oa[:, :n_off].reshape(N, Lq, M, L, P, 2)
    # TODO(synk): tiny (L*P) grouped softmax left in JAX (segmented lane softmax in-kernel
    # would need a grouped-reduce matmul trick; negligible cost at these sizes).
    aw = jax.nn.softmax(oa[:, n_off:].reshape(N, Lq, M, L * P), axis=-1)
    aw = aw.reshape(N, Lq, M, L, P)

    # offset_normalizer = stack([W, H]) per level
    offset_normalizer = jnp.array([[W, H] for (H, W) in spatial_shapes_py], jnp.float32)
    sampling_locations = (
        reference_points[:, :, None, :, None, :]
        + off / offset_normalizer[None, None, None, :, None, :]
    )
    sampled = deform_core(value, spatial_shapes_py, sampling_locations, aw)  # (N, Lq, D)

    out = linear_add_ln_pallas(sampled.reshape(N * Lq, D), src.reshape(N * Lq, D),
                               p["out_w"], p["out_b"], ln_g, ln_b)
    return out.reshape(N, Lq, D)


# --------------------------- cross-attention (MHA) ---------------------------

def cross_attention_norm(src, pos, text_memory, p, ln_g, ln_b, n_heads):
    """nn.MultiheadAttention(q=src+pos, k=v=text) -> + src -> LayerNorm (norm3)."""
    N, Lq, D = src.shape
    Lk = text_memory.shape[1]
    kv = linear_pallas(text_memory.reshape(N * Lk, D), p["wkv"], p["bkv"]).reshape(N, Lk, 2 * D)
    return xattn_fused_pallas(src, pos, kv, p["wq"], p["bq"], p["wo"], p["bo"],
                              ln_g, ln_b, n_heads)


# ---------------------------- full encoder layer -----------------------------

def visual_encoder_layer(src, pos, reference_points, spatial_shapes_py,
                         level_start_index, text_memory, text_mask, params,
                         n_heads, n_levels, n_points):
    del level_start_index  # implied statically by spatial_shapes_py
    # TODO(synk): text_mask / input padding_mask not applied (the reference forward does not
    # pass key_padding_mask to cross_attn either); dropout layers are identity (inference).
    del text_mask
    N, Lq, D = src.shape

    # --- multi-scale deformable self-attention (+ residual + norm1, fused epilogue) ---
    src = ms_deform_attn_norm(src, pos, reference_points, spatial_shapes_py,
                              params["deform"], params["ln1_g"], params["ln1_b"],
                              n_heads, n_levels, n_points)

    # --- cross attention with text memory (+ residual + norm3, fully fused) ---
    src = cross_attention_norm(src, pos, text_memory, params["xattn"],
                               params["ln3_g"], params["ln3_b"], n_heads)

    # --- FFN (linear1 -> relu -> linear2 -> residual -> norm2), fully fused ---
    src_flat = ffn_ln_pallas(src.reshape(N * Lq, D),
                             params["ffn_w1"], params["ffn_b1"],
                             params["ffn_w2"], params["ffn_b2"],
                             params["ln2_g"], params["ln2_b"])
    return src_flat.reshape(N, Lq, D), text_memory


# ------------------------------- parameters ----------------------------------

def init_params(key, D, d_ffn, M, L, P):
    ks = list(jax.random.split(key, 24))
    it = iter(ks)

    def w(shape, scale=0.05):
        return jax.random.normal(next(it), shape, jnp.float32) * scale

    return {
        "deform": {
            "off_w": w((D, M * L * P * 2), 0.02), "off_b": w((M * L * P * 2,), 0.02),
            "aw_w": w((D, M * L * P)), "aw_b": w((M * L * P,)),
            "value_w": w((D, D)), "value_b": w((D,)),
            "out_w": w((D, D)), "out_b": w((D,)),
        },
        "xattn": {
            "wq": w((D, D)), "bq": w((D,)),
            "wk": w((D, D)), "bk": w((D,)),
            "wv": w((D, D)), "bv": w((D,)),
            "wo": w((D, D)), "bo": w((D,)),
        },
        "ffn_w1": w((D, d_ffn)), "ffn_b1": w((d_ffn,)),
        "ffn_w2": w((d_ffn, D)), "ffn_b2": w((D,)),
        "ln1_g": jnp.ones((D,), jnp.float32), "ln1_b": jnp.zeros((D,), jnp.float32),
        "ln3_g": jnp.ones((D,), jnp.float32), "ln3_b": jnp.zeros((D,), jnp.float32),
        "ln2_g": jnp.ones((D,), jnp.float32), "ln2_b": jnp.zeros((D,), jnp.float32),
    }


def prepare_params(raw):
    """One-time prep (hoisted out of the hot path): fuse projections, cast MXU weights to
    bf16 (f32 accumulation in-kernel), reshape biases / LN params to lane rows (1, Dout)."""
    bf = lambda a: a.astype(jnp.bfloat16)
    row = lambda a: a.reshape(1, -1).astype(jnp.float32)
    d, x = raw["deform"], raw["xattn"]
    return {
        "deform": {
            "value_w": bf(d["value_w"]), "value_b": row(d["value_b"]),
            "offaw_w": bf(jnp.concatenate([d["off_w"], d["aw_w"]], axis=1)),
            "offaw_b": row(jnp.concatenate([d["off_b"], d["aw_b"]], axis=0)),
            "out_w": bf(d["out_w"]), "out_b": row(d["out_b"]),
        },
        "xattn": {
            "wq": bf(x["wq"]), "bq": row(x["bq"]),
            "wkv": bf(jnp.concatenate([x["wk"], x["wv"]], axis=1)),
            "bkv": row(jnp.concatenate([x["bk"], x["bv"]], axis=0)),
            "wo": bf(x["wo"]), "bo": row(x["bo"]),
        },
        "ffn_w1": bf(raw["ffn_w1"]), "ffn_b1": row(raw["ffn_b1"]),
        "ffn_w2": bf(raw["ffn_w2"]), "ffn_b2": row(raw["ffn_b2"]),
        "ln1_g": row(raw["ln1_g"]), "ln1_b": row(raw["ln1_b"]),
        "ln3_g": row(raw["ln3_g"]), "ln3_b": row(raw["ln3_b"]),
        "ln2_g": row(raw["ln2_g"]), "ln2_b": row(raw["ln2_b"]),
    }


# ------------------------------------ main ------------------------------------

if __name__ == "__main__":
    d_model, d_ffn, n_heads, n_levels, n_points = 32, 64, 4, 2, 2
    spatial_shapes_py = ((8, 8), (4, 4))           # two feature levels
    N = 2
    Lq = sum(h * w for h, w in spatial_shapes_py)  # 80 flattened visual tokens
    Lt = 8                                         # text sequence length

    key = jax.random.PRNGKey(0)
    k1, k2, k3, k4, kp = jax.random.split(key, 5)
    src = jax.random.normal(k1, (N, Lq, d_model), jnp.float32)
    pos = jax.random.normal(k2, (N, Lq, d_model), jnp.float32) * 0.1
    text_memory = jax.random.normal(k3, (N, Lt, d_model), jnp.float32)
    text_mask = jnp.zeros((N, Lt), dtype=bool)     # unused by the reference forward pass
    reference_points = jax.random.uniform(k4, (N, Lq, n_levels, 2),
                                          jnp.float32, 0.1, 0.9)
    level_start_index = jnp.array(
        [0, spatial_shapes_py[0][0] * spatial_shapes_py[0][1]], jnp.int32)

    params = prepare_params(init_params(kp, d_model, d_ffn, n_heads, n_levels, n_points))

    out, text_out = visual_encoder_layer(
        src, pos, reference_points, spatial_shapes_py, level_start_index,
        text_memory, text_mask, params, n_heads, n_levels, n_points)

    jax.block_until_ready(out)
    jax.block_until_ready(text_out)
    assert out.shape == (N, Lq, d_model) and text_out.shape == (N, Lt, d_model)
    assert bool(jnp.all(jnp.isfinite(out)))
    print("KERNEL_OK")
</pallas_src>

<mosaic_0001>
module attributes {stable_mosaic.version = 11 : i64} {
  func.func @_deform_proj_kernel(%arg0: i32, %arg1: memref<80x32xf32, #tpu.memory_space<vmem>>, %arg2: memref<80x32xf32, #tpu.memory_space<vmem>>, %arg3: memref<32x32xbf16, #tpu.memory_space<vmem>>, %arg4: memref<1x32xf32, #tpu.memory_space<vmem>>, %arg5: memref<32x48xbf16, #tpu.memory_space<vmem>>, %arg6: memref<1x48xf32, #tpu.memory_space<vmem>>, %arg7: memref<80x32xf32, #tpu.memory_space<vmem>>, %arg8: memref<80x48xf32, #tpu.memory_space<vmem>>) attributes {dimension_semantics = [#tpu.dimension_semantics<parallel>], iteration_bounds = array<i64: 2>, scalar_prefetch = 0 : i64, scratch_operands = 0 : i64, tpu.core_type = #tpu.core_type<tc>, window_params = [{transform_indices = @transform_0, window_bounds = array<i64: 80, 32>}, {transform_indices = @transform_1, window_bounds = array<i64: 80, 32>}, {pipeline_mode = #tpu.pipeline_mode<synchronous>, transform_indices = @transform_2, window_bounds = array<i64: 32, 32>}, {pipeline_mode = #tpu.pipeline_mode<synchronous>, transform_indices = @transform_3, window_bounds = array<i64: 1, 32>}, {pipeline_mode = #tpu.pipeline_mode<synchronous>, transform_indices = @transform_4, window_bounds = array<i64: 32, 48>}, {pipeline_mode = #tpu.pipeline_mode<synchronous>, transform_indices = @transform_5, window_bounds = array<i64: 1, 48>}, {transform_indices = @transform_6, window_bounds = array<i64: 80, 32>}, {transform_indices = @transform_7, window_bounds = array<i64: 80, 48>}]} {
    %c0 = arith.constant 0 : index
    %c0_0 = arith.constant 0 : index
    %0 = vector.load %arg1[%c0, %c0_0] : memref<80x32xf32, #tpu.memory_space<vmem>>, vector<80x32xf32>
    %c0_1 = arith.constant 0 : index
    %c0_2 = arith.constant 0 : index
    %1 = vector.load %arg2[%c0_1, %c0_2] : memref<80x32xf32, #tpu.memory_space<vmem>>, vector<80x32xf32>
    %2 = arith.addf %0, %1 : vector<80x32xf32>
    %3 = arith.truncf %0 : vector<80x32xf32> to vector<80x32xbf16>
    %c0_3 = arith.constant 0 : index
    %c0_4 = arith.constant 0 : index
    %4 = vector.load %arg3[%c0_3, %c0_4] : memref<32x32xbf16, #tpu.memory_space<vmem>>, vector<32x32xbf16>
    %cst = arith.constant dense<0.000000e+00> : vector<80x32xf32>
    %5 = tpu.matmul %3, %4, %cst {dimension_numbers = #tpu.dot_dimension_numbers<[1], [0], [0], [1], [0, 0, 1, 1], [], []>} : vector<80x32xbf16>, vector<32x32xbf16>, vector<80x32xf32> -> vector<80x32xf32>
    %c0_5 = arith.constant 0 : index
    %c0_6 = arith.constant 0 : index
    %6 = vector.load %arg4[%c0_5, %c0_6] : memref<1x32xf32, #tpu.memory_space<vmem>>, vector<1x32xf32>
    %7 = vector.broadcast %6 : vector<1x32xf32> to vector<80x32xf32>
    %8 = arith.addf %5, %7 : vector<80x32xf32>
    %c0_7 = arith.constant 0 : index
    %c0_8 = arith.constant 0 : index
    %9 = vector.load %arg7[%c0_7, %c0_8] : memref<80x32xf32, #tpu.memory_space<vmem>>, vector<80x32xf32>
    tpu.vector_store %arg7[%c0_7, %c0_8], %8 {strides = array<i32>} : memref<80x32xf32, #tpu.memory_space<vmem>>, vector<80x32xf32>,
    %10 = arith.truncf %2 : vector<80x32xf32> to vector<80x32xbf16>
    %c0_9 = arith.constant 0 : index
    %c0_10 = arith.constant 0 : index
    %11 = vector.load %arg5[%c0_9, %c0_10] : memref<32x48xbf16, #tpu.memory_space<vmem>>, vector<32x48xbf16>
    %cst_11 = arith.constant dense<0.000000e+00> : vector<80x48xf32>
    %12 = tpu.matmul %10, %11, %cst_11 {dimension_numbers = #tpu.dot_dimension_numbers<[1], [0], [0], [1], [0, 0, 1, 1], [], []>} : vector<80x32xbf16>, vector<32x48xbf16>, vector<80x48xf32> -> vector<80x48xf32>
    %c0_12 = arith.constant 0 : index
    %c0_13 = arith.constant 0 : index
    %13 = vector.load %arg6[%c0_12, %c0_13] : memref<1x48xf32, #tpu.memory_space<vmem>>, vector<1x48xf32>
    %14 = vector.broadcast %13 : vector<1x48xf32> to vector<80x48xf32>
    %15 = arith.addf %12, %14 : vector<80x48xf32>
    %c0_14 = arith.constant 0 : index
    %c0_15 = arith.constant 0 : index
    %16 = vector.load %arg8[%c0_14, %c0_15] : memref<80x48xf32, #tpu.memory_space<vmem>>, vector<80x48xf32>
    tpu.vector_store %arg8[%c0_14, %c0_15], %15 {strides = array<i32>} : memref<80x48xf32, #tpu.memory_space<vmem>>, vector<80x48xf32>,
    return
  }
  func.func @transform_0(%arg0: i32) -> (i32, i32) {
    %c0_i32 = arith.constant 0 : i32
    %c0_i32_0 = arith.constant 0 : i32
    return %arg0, %c0_i32 : i32, i32
  }
  func.func @transform_1(%arg0: i32) -> (i32, i32) {
    %c0_i32 = arith.constant 0 : i32
    %c0_i32_0 = arith.constant 0 : i32
    return %arg0, %c0_i32 : i32, i32
  }
  func.func @transform_2(%arg0: i32) -> (i32, i32) {
    %c0_i32 = arith.constant 0 : i32
    %c0_i32_0 = arith.constant 0 : i32
    %c0_i32_1 = arith.constant 0 : i32
    return %c0_i32, %c0_i32_0 : i32, i32
  }
  func.func @transform_3(%arg0: i32) -> (i32, i32) {
    %c0_i32 = arith.constant 0 : i32
    %c0_i32_0 = arith.constant 0 : i32
    %c0_i32_1 = arith.constant 0 : i32
    return %c0_i32, %c0_i32_0 : i32, i32
  }
  func.func @transform_4(%arg0: i32) -> (i32, i32) {
    %c0_i32 = arith.constant 0 : i32
    %c0_i32_0 = arith.constant 0 : i32
    %c0_i32_1 = arith.constant 0 : i32
    return %c0_i32, %c0_i32_0 : i32, i32
  }
  func.func @transform_5(%arg0: i32) -> (i32, i32) {
    %c0_i32 = arith.constant 0 : i32
    %c0_i32_0 = arith.constant 0 : i32
    %c0_i32_1 = arith.constant 0 : i32
    return %c0_i32, %c0_i32_0 : i32, i32
  }
  func.func @transform_6(%arg0: i32) -> (i32, i32) {
    %c0_i32 = arith.constant 0 : i32
    %c0_i32_0 = arith.constant 0 : i32
    return %arg0, %c0_i32 : i32, i32
  }
  func.func @transform_7(%arg0: i32) -> (i32, i32) {
    %c0_i32 = arith.constant 0 : i32
    %c0_i32_0 = arith.constant 0 : i32
    return %arg0, %c0_i32 : i32, i32
  }
}

</mosaic_0001>

<bundles_post_ra>
// kernel: tpu_custom_call.1
= control target key start
LH: loop header
LB: loop body
LE: loop exit
PB: predicated region body
PF: predicated region fallthrough
CT: control target
= control target key end

     0   :  { %s858_s24 = smov 0   ;;  %s1031_s0 = inlined_call_operand.vmem [shape: f32[160,32], index: 0, kind: input, shape index: {}]   ;;  %s1032_s1 = inlined_call_operand.vmem [shape: f32[160,32], index: 1, kind: input, shape index: {}]   ;;  %s1033_s2 = inlined_call_operand.vmem [shape: bf16[32,32], index: 2, kind: input, shape index: {}]   ;;  %s1034_s3 = inlined_call_operand.vmem [shape: f32[1,32], index: 3, kind: input, shape index: {}]   ;;  %s1035_s4 = inlined_call_operand.vmem [shape: bf16[32,48], index: 4, kind: input, shape index: {}]   ;;  %s1036_s5 = inlined_call_operand.vmem [shape: f32[1,48], index: 5, kind: input, shape index: {}]   ;;  %s1037_s6 = inlined_call_operand.vmem [shape: f32[160,32], index: 6, kind: output, shape index: {0}]   ;;  %s1038_s7 = inlined_call_operand.vmem [shape: f32[160,48], index: 7, kind: output, shape index: {1}]  }
   0x1 LB: > { %s705_s25 = sadd.s32 4294967295, %s814_s24   ;;  %p709_p0 = scmp.ge.s32.totalorder %s814_s24, 1  ;;  %s814_s24 = sphi %s858_s24, %s18_s24  }
   0x2   : > { %p252_p1 = scmp.lt.s32.totalorder %s814_s24, 3 }
   0x4   : > { %p253_p2 = pnand %p709_p0, %p252_p1 }
   0x5   : > { %v804_v0 = vld [vmem:[%s1033_s2] sm:$0xff] (!%p253_p2)   ;;  %v816_v1 = vmov (!%p253_p2), 0.0   ;;  %v806_v3 = vld [vmem:[%s1033_s2 + $0x8] sm:$0xff] (!%p253_p2)   ;;  %vm817_vm0 = vmmov (!%p253_p2), 0   ;;  %s294_s9 = smul.u32 (!%p253_p2), 10, %s705_s25  ;;  %vm377_vm1 = vcmask (!%p253_p2), 261120  }
   0x6   : > { %256 = sbr.rel (%p253_p2) target bundleno = 271 (0x10f), region = 44  ;;  %746 = vmatprep.subr.bf16.mxu0 (!%p253_p2), %v816_v1  ;;  %770 = vmatprep.subr.bf16.mxu1 (!%p253_p2), %v816_v1  ;;  %v805_v2 = vld [vmem:[%s1035_s4] sm:$0xff] (!%p253_p2)   ;;  %v807_v4 = vld [vmem:[%s1035_s4 + $0x8] sm:$0xff] (!%p253_p2)   ;;  %vm592_vm2 = vcmask (!%p253_p2), 392192  }
   0x7   : > { %747 = vmatpush3.bf16.msra.mxu0 (!%p253_p2), %v804_v0  ;;  %750 = vmatprep.mubr.msk.bf16.mxu0 (!%p253_p2), %vm817_vm0, %v816_v1  ;;  %p295_p3 = scmp.lt.s32.totalorder (!%p253_p2), %s294_s9, 19  ;;  %v949_v45 = vld [vmem:[%s1034_s3] ss:$0 sm:$0xff] (!%p253_p2) }
   0x8   : > { %771 = vmatpush3.bf16.msra.mxu1 (!%p253_p2), %v805_v2  ;;  %748 = vmatprep.subr.bf16.mxu0 (!%p253_p2), %v816_v1  ;;  %v961_v49 = vld [vmem:[%s1036_s5] ss:$0 sm:$0xff] (!%p253_p2) }
   0x9   : > { %772 = vmatprep.subr.bf16.mxu1 (!%p253_p2), %v816_v1  ;;  %774 = vmatprep.mubr.msk.bf16.mxu1 (!%p253_p2), %vm817_vm0, %v816_v1 }
   0xb   : > { %749 = vmatpush3.bf16.msra.mxu0 (!%p253_p2), %v806_v3 }
   0xc   : > { %773 = vmatpush3.bf16.msra.mxu1 (!%p253_p2), %v807_v4 }
   0xd   : > { %s1040_s9 = smov (!%p295_p3, %s294_s9), 19 }
   0xe   : > { %s886_s12 = sshll.u32 %s1040_s9, 3 }
   0xf   : > { %s892_s15 = scalar_lea.vmem %s1031_s0, %s886_s12  ;;  %s898_s18 = scalar_lea.vmem %s1032_s1, %s886_s12 }
  0x10   : > { %v319_v5 = vld [vmem:[%s892_s15] sm:$0xff]  ;;  %v320_v6 = vld [vmem:[%s892_s15 + $0x8] sm:$0xff]  ;;  %v321_v12 = vld [vmem:[%s892_s15 + $0x10] sm:$0xff]  ;;  %s955_s23 = scalar_lea.vmem %s1037_s6, %s886_s12  ;;  %s970_s29 = scalar_lea.vmem %s1038_s7, %s886_s12 }
  0x11   : > { %v329_v7 = vld [vmem:[%s898_s18] sm:$0xff]  ;;  %v349_v8 = vpack.c.bf16 %v320_v6, %v319_v5  ;;  %v330_v9 = vld [vmem:[%s898_s18 + $0x8] sm:$0xff]  ;;  %v322_v13 = vld [vmem:[%s892_s15 + $0x18] sm:$0xff] }
  0x12   : > { %v339_v10 = vadd.f32 %v329_v7, %v319_v5  ;;  %v340_v11 = vadd.f32 %v330_v9, %v320_v6  ;;  %v331_v14 = vld [vmem:[%s898_s18 + $0x10] sm:$0xff]  ;;  %v332_v15 = vld [vmem:[%s898_s18 + $0x18] sm:$0xff]  ;;  %v350_v19 = vpack.c.bf16 %v322_v13, %v321_v12  ;;  %v323_v21 = vld [vmem:[%s892_s15 + $0x20] sm:$0xff] }
  0x13   : > { %751 = vmatmul.mubr.msk.bf16.vlgmr.msra.gmra.mrb[0].mxu0 %vm377_vm1, %v349_v8  ;;  %v341_v17 = vadd.f32 %v331_v14, %v321_v12  ;;  %v342_v18 = vadd.f32 %v332_v15, %v322_v13  ;;  %v324_v22 = vld [vmem:[%s892_s15 + $0x28] sm:$0xff]  ;;  %v333_v23 = vld [vmem:[%s898_s18 + $0x20] sm:$0xff]  ;;  %v325_v29 = vld [vmem:[%s892_s15 + $0x30] sm:$0xff] }
  0x14   : > { %v476_v16 = vpack.c.bf16 %v340_v11, %v339_v10  ;;  %754 = vmatprep.mubr.msk.bf16.mxu0 %vm817_vm0, %v816_v1  ;;  %v334_v24 = vld [vmem:[%s898_s18 + $0x28] sm:$0xff]  ;;  %v343_v25 = vadd.f32 %v333_v23, %v323_v21  ;;  %v351_v27 = vpack.c.bf16 %v324_v22, %v323_v21  ;;  %v326_v30 = vld [vmem:[%s892_s15 + $0x38] sm:$0xff]  ;;  %v335_v31 = vld [vmem:[%s898_s18 + $0x30] sm:$0xff] }
  0x15   : > { %v477_v20 = vpack.c.bf16 %v342_v18, %v341_v17  ;;  %v344_v26 = vadd.f32 %v334_v24, %v324_v22  ;;  %v336_v32 = vld [vmem:[%s898_s18 + $0x38] sm:$0xff]  ;;  %v345_v33 = vadd.f32 %v335_v31, %v325_v29  ;;  %v352_v35 = vpack.c.bf16 %v326_v30, %v325_v29  ;;  %v327_v37 = vld [vmem:[%s892_s15 + $0x40] sm:$0xff]  ;;  %v328_v38 = vld [vmem:[%s892_s15 + $0x48] sm:$0xff] }
  0x16   : > { %775 = vmatmul.mubr.msk.bf16.vlgmr.msra.gmra.mrb[0].mxu1 %vm377_vm1, %v476_v16  ;;  %v346_v34 = vadd.f32 %v336_v32, %v326_v30  ;;  %v337_v39 = vld [vmem:[%s898_s18 + $0x40] sm:$0xff]  ;;  %v338_v40 = vld [vmem:[%s898_s18 + $0x48] sm:$0xff]  ;;  %v353_v43 = vpack.c.bf16 %v328_v38, %v327_v37 }
  0x17   : > { %778 = vmatprep.mubr.msk.bf16.mxu1 %vm817_vm0, %v816_v1  ;;  %v478_v28 = vpack.c.bf16 %v344_v26, %v343_v25  ;;  %v347_v41 = vadd.f32 %v337_v39, %v327_v37  ;;  %v348_v42 = vadd.f32 %v338_v40, %v328_v38 }
  0x18   : > { %v479_v36 = vpack.c.bf16 %v346_v34, %v345_v33 }
  0x19   : > { %v480_v44 = vpack.c.bf16 %v348_v42, %v347_v41 }
  0x1b   : > { %755 = vmatmul.mubr.msk.bf16.gmra.mrb[4].mxu0 %vm377_vm1, %v350_v19 }
  0x1c   : > { %758 = vmatprep.mubr.msk.bf16.mxu0 %vm817_vm0, %v816_v1 }
  0x1e   : > { %779 = vmatmul.mubr.msk.bf16.gmra.mrb[4].mxu1 %vm377_vm1, %v477_v20 }
  0x1f   : > { %782 = vmatprep.mubr.msk.bf16.mxu1 %vm817_vm0, %v816_v1 }
  0x23   : > { %759 = vmatmul.mubr.msk.bf16.gmra.mrb[8].mxu0 %vm377_vm1, %v351_v27 }
  0x24   : > { %762 = vmatprep.mubr.msk.bf16.mxu0 %vm817_vm0, %v816_v1 }
  0x26   : > { %783 = vmatmul.mubr.msk.bf16.gmra.mrb[8].mxu1 %vm377_vm1, %v478_v28 }
  0x27   : > { %786 = vmatprep.mubr.msk.bf16.mxu1 %vm817_vm0, %v816_v1 }
  0x2b   : > { %763 = vmatmul.mubr.msk.bf16.gmra.mrb[12].mxu0 %vm377_vm1, %v352_v35 }
  0x2c   : > { %766 = vmatprep.mubr.msk.bf16.mxu0 %vm817_vm0, %v816_v1 }
  0x2e   : > { %787 = vmatmul.mubr.msk.bf16.gmra.mrb[12].mxu1 %vm377_vm1, %v479_v36 }
  0x2f   : > { %790 = vmatprep.mubr.msk.bf16.mxu1 %vm817_vm0, %v816_v1 }
  0x33   : > { %767 = vmatmul.mubr.msk.bf16.gmra.mrb[16].mxu0 %vm377_vm1, %v353_v43 }
  0x36   : > { %791 = vmatmul.mubr.msk.bf16.gmra.mrb[16].mxu1 %vm377_vm1, %v480_v44 }
  0xe6   : > { %v427_v46 = vpop.f32.mrb[0].mxu0 }
  0xe7   : > { %v428_v47 = vadd.f32 %v949_v45, %v427_v46  ;;  %v752_v48 = vpop.f32.mrb[1].mxu0 }
  0xe8   : > { %v430_v50 = vpop.f32.mrb[2].mxu0 }
  0xe9   : > { %466 = vst.msk [vmem:[%s955_s23] sm:$0xff] %vm377_vm1, %v428_v47  ;;  %v431_v51 = vadd.f32 %v949_v45, %v430_v50  ;;  %v553_v52 = vpop.f32.mrb[0].mxu1  ;;  %v753_v53 = vpop.f32.mrb[3].mxu0 }
  0xea   : > { %v554_v54 = vadd.f32 %v961_v49, %v553_v52  ;;  %v776_v55 = vpop.f32.mrb[1].mxu1 }
  0xeb   : > { %467 = vst.msk [vmem:[%s955_s23 + $0x8] sm:$0xff] %vm377_vm1, %v431_v51  ;;  %v556_v56 = vpop.f32.mrb[2].mxu1 }
  0xec   : > { %593 = vst.msk [vmem:[%s970_s29] sm:$0xff] %vm592_vm2, %v554_v54  ;;  %v557_v57 = vadd.f32 %v961_v49, %v556_v56  ;;  %v777_v58 = vpop.f32.mrb[3].mxu1 }
  0xee   : > { %594 = vst.msk [vmem:[%s970_s29 + $0x8] sm:$0xff] %vm592_vm2, %v557_v57  ;;  %v435_v59 = vpop.f32.mrb[4].mxu0 }
  0xef   : > { %v436_v60 = vadd.f32 %v949_v45, %v435_v59  ;;  %v756_v61 = vpop.f32.mrb[5].mxu0 }
  0xf0   : > { %v438_v62 = vpop.f32.mrb[6].mxu0 }
  0xf1   : > { %468 = vst.msk [vmem:[%s955_s23 + $0x10] sm:$0xff] %vm377_vm1, %v436_v60  ;;  %v439_v63 = vadd.f32 %v949_v45, %v438_v62  ;;  %v561_v0 = vpop.f32.mrb[4].mxu1  ;;  %v757_v1 = vpop.f32.mrb[7].mxu0 }
  0xf2   : > { %v562_v2 = vadd.f32 %v961_v49, %v561_v0  ;;  %v780_v3 = vpop.f32.mrb[5].mxu1 }
  0xf3   : > { %469 = vst.msk [vmem:[%s955_s23 + $0x18] sm:$0xff] %vm377_vm1, %v439_v63  ;;  %v564_v4 = vpop.f32.mrb[6].mxu1 }
  0xf4   : > { %595 = vst.msk [vmem:[%s970_s29 + $0x10] sm:$0xff] %vm592_vm2, %v562_v2  ;;  %v565_v5 = vadd.f32 %v961_v49, %v564_v4  ;;  %v781_v6 = vpop.f32.mrb[7].mxu1 }
  0xf6   : > { %596 = vst.msk [vmem:[%s970_s29 + $0x18] sm:$0xff] %vm592_vm2, %v565_v5  ;;  %v443_v7 = vpop.f32.mrb[8].mxu0 }
  0xf7   : > { %v444_v8 = vadd.f32 %v949_v45, %v443_v7  ;;  %v760_v9 = vpop.f32.mrb[9].mxu0 }
  0xf8   : > { %v446_v10 = vpop.f32.mrb[10].mxu0 }
  0xf9   : > { %470 = vst.msk [vmem:[%s955_s23 + $0x20] sm:$0xff] %vm377_vm1, %v444_v8  ;;  %v447_v11 = vadd.f32 %v949_v45, %v446_v10  ;;  %v569_v12 = vpop.f32.mrb[8].mxu1  ;;  %v761_v13 = vpop.f32.mrb[11].mxu0 }
  0xfa   : > { %v570_v14 = vadd.f32 %v961_v49, %v569_v12  ;;  %v784_v15 = vpop.f32.mrb[9].mxu1 }
  0xfb   : > { %471 = vst.msk [vmem:[%s955_s23 + $0x28] sm:$0xff] %vm377_vm1, %v447_v11  ;;  %v572_v16 = vpop.f32.mrb[10].mxu1 }
  0xfc   : > { %597 = vst.msk [vmem:[%s970_s29 + $0x20] sm:$0xff] %vm592_vm2, %v570_v14  ;;  %v573_v17 = vadd.f32 %v961_v49, %v572_v16  ;;  %v785_v18 = vpop.f32.mrb[11].mxu1 }
  0xfe   : > { %598 = vst.msk [vmem:[%s970_s29 + $0x28] sm:$0xff] %vm592_vm2, %v573_v17  ;;  %v451_v19 = vpop.f32.mrb[12].mxu0 }
  0xff   : > { %v452_v20 = vadd.f32 %v949_v45, %v451_v19  ;;  %v764_v21 = vpop.f32.mrb[13].mxu0 }
 0x100   : > { %v454_v22 = vpop.f32.mrb[14].mxu0 }
 0x101   : > { %472 = vst.msk [vmem:[%s955_s23 + $0x30] sm:$0xff] %vm377_vm1, %v452_v20  ;;  %v455_v23 = vadd.f32 %v949_v45, %v454_v22  ;;  %v577_v24 = vpop.f32.mrb[12].mxu1  ;;  %v765_v25 = vpop.f32.mrb[15].mxu0 }
 0x102   : > { %v578_v26 = vadd.f32 %v961_v49, %v577_v24  ;;  %v788_v27 = vpop.f32.mrb[13].mxu1 }
 0x103   : > { %473 = vst.msk [vmem:[%s955_s23 + $0x38] sm:$0xff] %vm377_vm1, %v455_v23  ;;  %v580_v28 = vpop.f32.mrb[14].mxu1 }
 0x104   : > { %599 = vst.msk [vmem:[%s970_s29 + $0x30] sm:$0xff] %vm592_vm2, %v578_v26  ;;  %v581_v29 = vadd.f32 %v961_v49, %v580_v28  ;;  %v789_v30 = vpop.f32.mrb[15].mxu1 }
 0x106   : > { %600 = vst.msk [vmem:[%s970_s29 + $0x38] sm:$0xff] %vm592_vm2, %v581_v29  ;;  %v459_v31 = vpop.f32.mrb[16].mxu0 }
 0x107   : > { %v460_v32 = vadd.f32 %v949_v45, %v459_v31  ;;  %v768_v33 = vpop.f32.mrb[17].mxu0 }
 0x108   : > { %v462_v34 = vpop.f32.mrb[18].mxu0 }
 0x109   : > { %474 = vst.msk [vmem:[%s955_s23 + $0x40] sm:$0xff] %vm377_vm1, %v460_v32  ;;  %v463_v35 = vadd.f32 %v949_v45, %v462_v34  ;;  %v585_v36 = vpop.f32.mrb[16].mxu1  ;;  %v769_v37 = vpop.f32.mrb[19].mxu0 }
 0x10a   : > { %v586_v38 = vadd.f32 %v961_v49, %v585_v36  ;;  %v792_v39 = vpop.f32.mrb[17].mxu1 }
 0x10b   : > { %475 = vst.msk [vmem:[%s955_s23 + $0x48] sm:$0xff] %vm377_vm1, %v463_v35  ;;  %v588_v40 = vpop.f32.mrb[18].mxu1 }
 0x10c   : > { %601 = vst.msk [vmem:[%s970_s29 + $0x40] sm:$0xff] %vm592_vm2, %v586_v38  ;;  %v589_v41 = vadd.f32 %v961_v49, %v588_v40  ;;  %v793_v42 = vpop.f32.mrb[19].mxu1 }
 0x10e   : > { %602 = vst.msk [vmem:[%s970_s29 + $0x48] sm:$0xff] %vm592_vm2, %v589_v41 }
 0x10f PF: > { %s18_s24 = sadd.s32 1, %s814_s24  }
 0x110   : > { %p15_p4 = scmp.ge.s32.totalorder %s18_s24, 4  }
 0x112   :  { %17 = sbr.rel (!%p15_p4) target bundleno = 1 (0x1), region = 89 }

</bundles_post_ra>
